<compile_context>
chip_gen: v5e
topology: v5e:2x2
jax: 0.10.0
libtpu: 0.0.40
codegen_flags: <defaults>
</compile_context>

<pallas_src>
import jax
import jax.numpy as jnp
from jax.experimental import pallas as pl
from jax.experimental.pallas import tpu as pltpu


# ----------------------------- kernel body ---------------------------------

def _make_kernel(n_rows, tile_n, has_weight, needs_mask):
    """Build the kernel specialized on (static) N, tile size, weight, masking."""

    def kernel(*refs):
        if has_weight:
            x_ref, t_ref, w_ref, o_ref = refs
        else:
            x_ref, t_ref, o_ref = refs

        x = x_ref[...].astype(jnp.float32)                     # (TN, C) logits
        t = t_ref[...].astype(jnp.float32)                     # (TN, C) probs
        if has_weight:
            tw = t * w_ref[...].astype(jnp.float32)            # (TN, C)
        else:
            tw = t

        # numerically-stable log-sum-exp per row
        m = jnp.max(x, axis=-1, keepdims=True)                 # (TN, 1)
        sum_exp = jnp.sum(jnp.exp(x - m), axis=-1)             # (TN,)
        lse = m.reshape(-1) + jnp.log(sum_exp)                 # (TN,)

        # loss_n = sum_c t*w*(lse - x) = lse * sum_c(t*w) - sum_c(t*w*x)
        # TODO(synk): on v6e/v7x the three C-axis reductions could be offloaded
        # to the MXU as one (TN,C)@(C,k) dot against stacked [ones, w] columns.
        tw_sum = jnp.sum(tw, axis=-1)                          # (TN,)
        twx_sum = jnp.sum(tw * x, axis=-1)                     # (TN,)
        per_row = lse * tw_sum - twx_sum                       # (TN,)

        out = per_row.reshape(1, tile_n)                       # lane-dense row

        if needs_mask:
            # zero the tail rows of the (only) partial block: OOB input rows
            # may be garbage/NaN, but they only affect their own row's loss.
            i = pl.program_id(0)
            lane = jax.lax.broadcasted_iota(jnp.int32, (1, tile_n), 1)
            out = jnp.where(lane < (n_rows - i * tile_n), out, 0.0)

        o_ref[...] = out

    return kernel


# ----------------------------- tiling logic --------------------------------

_MAX_TILE_ROWS = 8192          # absolute cap (block already >= 1-4 MiB there)


def _cdiv(a, b):
    return -(-a // b)


def _round_up(x, m):
    return ((x + m - 1) // m) * m


def _vmem_limit_bytes():
    """Generation-aware scoped-VMEM limit: ~3/4 of capacity, capped at 96 MiB
    (v5e/v6e: 128 MiB physical -> 96 MiB; v7x: 64 MiB physical -> 48 MiB)."""
    cap = 64 * 1024 * 1024                      # assume tightest gen (v7x)
    try:
        info = pltpu.get_tpu_info()
        cap = int(getattr(info, "vmem_capacity_bytes", cap)) or cap
    except Exception:
        pass
    return min((cap * 3) // 4, 96 * 1024 * 1024)


def _pick_tile_rows(n, c, itemsize, vmem_limit):
    """Largest 128-multiple row tile whose streamed inputs (2 arrays x 2
    pipeline buffers) PLUS the live f32 in-kernel temporaries fit the VMEM
    budget; prefers >= 2 grid blocks so v7x can use both TensorCores."""
    per_row = 2 * 2 * c * itemsize + 6 * c * 4      # DMA buffers + f32 temps
    budget = max(vmem_limit - 4 * 1024 * 1024, 1 * 1024 * 1024)
    rows = budget // per_row
    rows = min(rows, _MAX_TILE_ROWS)
    if n > 128:
        # keep at least 2 blocks so the "parallel" axis can shard across both
        # v7x TensorCores (a single extra cheap step on single-TC v5e/v6e).
        rows = min(rows, _round_up(_cdiv(n, 2), 128))
    rows = (rows // 128) * 128
    return max(128, rows)
    # TODO(synk): for vocab-scale C where even a 128-row block overflows VMEM,
    # add an 'arbitrary' reduction grid axis over C with an online
    # (max, sum-exp, weighted-sum) accumulator instead of shrinking rows.


def _normalize_tile(n, rows):
    """Single block covering all rows (8-multiple), or a 128-multiple tile so
    the lane-dense (1, tile_n) output blocks are unmasked stores."""
    if rows >= n:
        return _round_up(n, 8)
    return _round_up(max(rows, 128), 128)


# ------------------------------- wrapper ------------------------------------

def cross_entropy_with_probs(logits, target, weight=None, reduction="mean",
                             tile_n=None):
    """Pallas forward of CrossEntropyLossWithProbs.

    logits: (N, C) float, target: (N, C) float probabilities,
    weight: optional (C,) per-class rescaling.
    reduction: 'none' -> (N,), 'sum' -> scalar, 'mean' -> scalar (sum / N).
    """
    if reduction not in ("none", "sum", "mean"):
        raise ValueError(f"Unknown reduction: {reduction}")

    logits = jnp.asarray(logits)
    target = jnp.asarray(target)
    if logits.ndim != 2:
        # TODO(synk): K-dimensional (N, C, d1..dK) loss not implemented; the
        # snorkel reference implementation is also 2-D only.
        raise NotImplementedError("expected (N, C) inputs")
    N, C = logits.shape
    if target.shape != (N, C):
        raise ValueError("target must have the same (N, C) shape as input")

    has_weight = weight is not None
    w2d = jnp.asarray(weight, jnp.float32).reshape(1, C) if has_weight else None

    itemsize = max(jnp.dtype(logits.dtype).itemsize,
                   jnp.dtype(target.dtype).itemsize)
    vmem_limit = _vmem_limit_bytes()

    if tile_n is None:
        rows = _pick_tile_rows(N, C, itemsize, vmem_limit)
    else:
        rows = max(8, int(tile_n))
    tile = _normalize_tile(N, rows)
    num_blocks = _cdiv(N, tile)
    needs_mask = (num_blocks * tile) != N

    in_specs = [
        pl.BlockSpec((tile, C), lambda i: (i, 0)),     # logits
        pl.BlockSpec((tile, C), lambda i: (i, 0)),     # target probabilities
    ]
    args = [logits, target]
    if has_weight:
        in_specs.append(pl.BlockSpec((1, C), lambda i: (0, 0)))   # class weights
        args.append(w2d)

    rows_out = pl.pallas_call(
        _make_kernel(N, tile, has_weight, needs_mask),
        out_shape=jax.ShapeDtypeStruct((1, num_blocks * tile), jnp.float32),
        grid_spec=pltpu.PrefetchScalarGridSpec(
            num_scalar_prefetch=0,
            grid=(num_blocks,),
            in_specs=in_specs,
            out_specs=pl.BlockSpec((1, tile), lambda i: (0, i)),
        ),
        compiler_params=pltpu.CompilerParams(
            dimension_semantics=("parallel",),         # megacore-shardable
            vmem_limit_bytes=vmem_limit),
    )(*args)

    if reduction == "none":
        return rows_out.reshape(-1)[:N]
    elif reduction == "sum":
        return jnp.sum(rows_out)                       # masked tail rows are 0
    else:  # "mean" -- snorkel semantics: divide by N
        return jnp.sum(rows_out) / jnp.float32(N)


class CrossEntropyLossWithProbs:
    """Drop-in analogue of the PyTorch module (forward only)."""

    def __init__(self, weight=None, reduction="mean"):
        self.weight = weight
        self.reduction = reduction

    def __call__(self, input, target):
        return cross_entropy_with_probs(
            input, target, weight=self.weight, reduction=self.reduction)


# ------------------------------- reference ----------------------------------

def _reference(logits, target, weight, reduction):
    logp = jax.nn.log_softmax(jnp.asarray(logits, jnp.float32), axis=-1)
    if weight is None:
        w = jnp.ones((logits.shape[1],), jnp.float32)
    else:
        w = jnp.asarray(weight, jnp.float32)
    per = -jnp.sum(jnp.asarray(target, jnp.float32) * w[None, :] * logp, axis=-1)
    if reduction == "none":
        return per
    if reduction == "sum":
        return jnp.sum(per)
    return jnp.mean(per)


if __name__ == "__main__":
    key = jax.random.PRNGKey(0)
    k1, k2, k3, k4, k5 = jax.random.split(key, 5)

    # 1) Small weighted f32 case (single block, no tail mask).
    N, C = 8, 32
    logits = jax.random.normal(k1, (N, C), jnp.float32)
    target = jax.nn.softmax(jax.random.normal(k2, (N, C), jnp.float32), axis=-1)
    weight = jax.random.uniform(k3, (C,), jnp.float32, minval=0.5, maxval=1.5)

    module = CrossEntropyLossWithProbs(weight=weight, reduction="mean")
    loss = jax.block_until_ready(module(logits, target))
    ref = _reference(logits, target, weight, "mean")
    assert jnp.allclose(loss, ref, rtol=1e-5, atol=1e-5), (loss, ref)

    loss_none = jax.block_until_ready(
        cross_entropy_with_probs(logits, target, weight=weight, reduction="none"))
    ref_none = _reference(logits, target, weight, "none")
    assert loss_none.shape == (N,)
    assert jnp.allclose(loss_none, ref_none, rtol=1e-5, atol=1e-5)

    # 2) Multi-block + ragged tail (N % tile_n != 0), bf16 inputs streamed in
    #    bf16 and upcast in-kernel; unweighted specialized kernel path.
    N2, C2 = 300, 128
    logits2 = jax.random.normal(k4, (N2, C2), jnp.float32).astype(jnp.bfloat16)
    target2 = jax.nn.softmax(
        jax.random.normal(k5, (N2, C2), jnp.float32), axis=-1).astype(jnp.bfloat16)
    for red in ("mean", "sum", "none"):
        got = jax.block_until_ready(
            cross_entropy_with_probs(logits2, target2, weight=None,
                                     reduction=red, tile_n=128))
        exp = _reference(logits2, target2, None, red)
        assert jnp.allclose(got, exp, rtol=1e-4, atol=1e-4), (red, got, exp)

    # 3) Auto-tiled path (VMEM-sized tile, >=2 blocks, tail mask), weighted.
    weight2 = jax.random.uniform(k3, (C2,), jnp.float32, minval=0.5, maxval=1.5)
    got = jax.block_until_ready(
        cross_entropy_with_probs(logits2, target2, weight=weight2,
                                 reduction="mean"))
    exp = _reference(logits2, target2, weight2, "mean")
    assert jnp.allclose(got, exp, rtol=1e-4, atol=1e-4), (got, exp)

    print("KERNEL_OK")
</pallas_src>

<mosaic_0001>
module attributes {stable_mosaic.version = 11 : i64} {
  func.func @kernel(%arg0: i32, %arg1: memref<8x32xf32, #tpu.memory_space<vmem>>, %arg2: memref<8x32xf32, #tpu.memory_space<vmem>>, %arg3: memref<1x32xf32, #tpu.memory_space<vmem>>, %arg4: memref<1x8xf32, #tpu.memory_space<vmem>>) attributes {dimension_semantics = [#tpu.dimension_semantics<parallel>], iteration_bounds = array<i64: 1>, scalar_prefetch = 0 : i64, scratch_operands = 0 : i64, tpu.core_type = #tpu.core_type<tc>, window_params = [{transform_indices = @transform_0, window_bounds = array<i64: 8, 32>}, {transform_indices = @transform_1, window_bounds = array<i64: 8, 32>}, {pipeline_mode = #tpu.pipeline_mode<synchronous>, transform_indices = @transform_2, window_bounds = array<i64: 1, 32>}, {transform_indices = @transform_3, window_bounds = array<i64: 1, 8>}]} {
    %c0 = arith.constant 0 : index
    %c0_0 = arith.constant 0 : index
    %0 = vector.load %arg1[%c0, %c0_0] : memref<8x32xf32, #tpu.memory_space<vmem>>, vector<8x32xf32>
    %c0_1 = arith.constant 0 : index
    %c0_2 = arith.constant 0 : index
    %1 = vector.load %arg2[%c0_1, %c0_2] : memref<8x32xf32, #tpu.memory_space<vmem>>, vector<8x32xf32>
    %c0_3 = arith.constant 0 : index
    %c0_4 = arith.constant 0 : index
    %2 = vector.load %arg3[%c0_3, %c0_4] : memref<1x32xf32, #tpu.memory_space<vmem>>, vector<1x32xf32>
    %3 = vector.broadcast %2 : vector<1x32xf32> to vector<8x32xf32>
    %4 = arith.mulf %1, %3 : vector<8x32xf32>
    %cst = arith.constant dense<0xFF800000> : vector<8xf32>
    %5 = vector.multi_reduction <maximumf>, %0, %cst [1] : vector<8x32xf32> to vector<8xf32>
    %6 = vector.shape_cast %5 : vector<8xf32> to vector<8x1xf32>
    %7 = vector.broadcast %6 : vector<8x1xf32> to vector<8x32xf32>
    %8 = arith.subf %0, %7 : vector<8x32xf32>
    %9 = math.exp %8 : vector<8x32xf32>
    %cst_5 = arith.constant dense<0.000000e+00> : vector<8xf32>
    %10 = vector.multi_reduction <add>, %9, %cst_5 [1] : vector<8x32xf32> to vector<8xf32>
    %11 = vector.shape_cast %6 : vector<8x1xf32> to vector<8xf32>
    %12 = math.log %10 : vector<8xf32>
    %13 = arith.addf %11, %12 : vector<8xf32>
    %cst_6 = arith.constant dense<0.000000e+00> : vector<8xf32>
    %14 = vector.multi_reduction <add>, %4, %cst_6 [1] : vector<8x32xf32> to vector<8xf32>
    %15 = arith.mulf %4, %0 : vector<8x32xf32>
    %cst_7 = arith.constant dense<0.000000e+00> : vector<8xf32>
    %16 = vector.multi_reduction <add>, %15, %cst_7 [1] : vector<8x32xf32> to vector<8xf32>
    %17 = arith.mulf %13, %14 : vector<8xf32>
    %18 = arith.subf %17, %16 : vector<8xf32>
    %19 = vector.shape_cast %18 : vector<8xf32> to vector<1x8xf32>
    %c0_8 = arith.constant 0 : index
    %c0_9 = arith.constant 0 : index
    %20 = vector.load %arg4[%c0_8, %c0_9] : memref<1x8xf32, #tpu.memory_space<vmem>>, vector<1x8xf32>
    tpu.vector_store %arg4[%c0_8, %c0_9], %19 {strides = array<i32>} : memref<1x8xf32, #tpu.memory_space<vmem>>, vector<1x8xf32>,
    return
  }
  func.func @transform_0(%arg0: i32) -> (i32, i32) {
    %c0_i32 = arith.constant 0 : i32
    %c0_i32_0 = arith.constant 0 : i32
    return %arg0, %c0_i32 : i32, i32
  }
  func.func @transform_1(%arg0: i32) -> (i32, i32) {
    %c0_i32 = arith.constant 0 : i32
    %c0_i32_0 = arith.constant 0 : i32
    return %arg0, %c0_i32 : i32, i32
  }
  func.func @transform_2(%arg0: i32) -> (i32, i32) {
    %c0_i32 = arith.constant 0 : i32
    %c0_i32_0 = arith.constant 0 : i32
    %c0_i32_1 = arith.constant 0 : i32
    return %c0_i32, %c0_i32_0 : i32, i32
  }
  func.func @transform_3(%arg0: i32) -> (i32, i32) {
    %c0_i32 = arith.constant 0 : i32
    %c0_i32_0 = arith.constant 0 : i32
    return %c0_i32, %arg0 : i32, i32
  }
}

</mosaic_0001>

<bundles_post_ra>
// kernel: tpu_custom_call.1
= control target key start
LH: loop header
LB: loop body
LE: loop exit
PB: predicated region body
PF: predicated region fallthrough
CT: control target
= control target key end

     0   :  { %8 = vsyncpa [#allocation3], 0  ;;  %s222_s0 = inlined_call_operand.hbm [shape: f32[8,32], index: 0, kind: input, shape index: {}]   ;;  %s223_s1 = inlined_call_operand.hbm [shape: f32[8,32], index: 1, kind: input, shape index: {}]   ;;  %s224_s2 = inlined_call_operand.vmem [shape: f32[1,32], index: 2, kind: input, shape index: {}]   ;;  %s225_s3 = inlined_call_operand.hbm [shape: f32[1,8], index: 3, kind: output, shape index: {}]  }
   0x1   :  { %9 = vsyncpa [#allocation6], 0 }
   0x2   :  { %10 = vsyncpa [#allocation4], 0  ;;  %s16_s14 = sshll.u32 %s222_s0, 4  ;;  %s183_s15 = smov [#allocation2]   ;;  %s17_s14 = int_to_ptr.hbm [resolvable:$true] %s16_s14 }
   0x3   :  { %s18_s16 = sshll.u32 %s183_s15, 4  ;;  %s27_s19 = sshll.u32 %s223_s1, 4  ;;  %s19_s16 = int_to_ptr.vmem [resolvable:$true] %s18_s16  ;;  %s28_s19 = int_to_ptr.hbm [resolvable:$true] %s27_s19 }
   0x4   :  { %21 = dma.hbm_to_vmem [thread:$0]  %s17_s14, 128, %s19_s16, [#allocation3]  }
   0x5   :  { %s184_s20 = smov [#allocation5]  }
   0x6   :  { %s29_s21 = sshll.u32 %s184_s20, 4  ;;  %s30_s21 = int_to_ptr.vmem [resolvable:$true] %s29_s21 }
   0x7   :  { %32 = dma.hbm_to_vmem [thread:$0]  %s28_s19, 128, %s30_s21, [#allocation6]  }
   0x8   :  { %177 = dma.done.wait [#allocation3], 128  }
   0x9   :  { %178 = vsyncadd [#allocation3], 4294967168 }
   0xa   :  { %179 = dma.done.wait [#allocation6], 128  }
   0xb   :  { %180 = vsyncadd [#allocation6], 4294967168  ;;  %vm50_vm0 = vcmask 261120   ;;  %v43_v0 = vld [vmem:[#allocation2] sm:$0xff]  ;;  %v44_v2 = vld [vmem:[#allocation5] sm:$0xff]  ;;  %v73_v17 = vlaneseq  ;;  %s185_s1 = smov [#allocation7]  }
   0xc   :  { %v51_v1 = vsel %vm50_vm0, %v43_v0, -inf  ;;  %v100_v3 = vld [vmem:[%s224_s2] ss:$0 sm:$0xff]  ;;  %s84_s2 = sshll.u32 %s185_s1, 4  ;;  %s86_s25 = sshll.u32 %s225_s3, 4  ;;  %vm77_vm1 = vcmask 57344   ;;  %s85_s2 = int_to_ptr.vmem [resolvable:$true] %s84_s2  ;;  %s87_s25 = int_to_ptr.hbm [resolvable:$true] %s86_s25 }
   0xd   :  { %52 = vmax.xlane.f32.xlu0 %v51_v1  ;;  %v49_v4 = vmul.f32 %v100_v3, %v44_v2  ;;  %v74_v21 = vand.u32 127, %v73_v17 }
   0xf   :  { %v63_v5 = vsel %vm50_vm0, %v49_v4, 0.0  ;;  %v66_v6 = vmul.f32 %v49_v4, %v43_v0 }
  0x10   :  { %64 = vadd.xlane.f32.xlu1 %v63_v5 }
  0x11   :  { %v67_v7 = vsel %vm50_vm0, %v66_v6, 0.0 }
  0x18   :  { %68 = vadd.xlane.f32.xlu1 %v67_v7 }
  0x80   :  { %v53_v8 = vpop.xlane.xlu0 %52 }
  0x81   :  { %v54_v9 = vsub.f32 %v43_v0, %v53_v8 }
  0x83   :  { %v55_v10 = vmul.f32 1.442695, %v54_v9  ;;  %v65_v14 = vpop.xlane.xlu1 %64 }
  0x85   :  { %101 = vpow2.f32 %v55_v10 }
  0x8b   :  { %v102_v11 = vpop.eup %101  ;;  %v69_v19 = vpop.xlane.xlu1 %68 }
  0x8c   :  { %v57_v12 = vsel %vm50_vm0, %v102_v11, 0.0 }
  0x8d   :  { %58 = vadd.xlane.f32.xlu0 %v57_v12 }
 0x100   :  { %v59_v13 = vpop.xlane.xlu0 %58 }
 0x101   :  { %103 = vlog2.f32 %v59_v13 }
 0x107   :  { %v104_v15 = vpop.eup %103 }
 0x108   :  { %v61_v16 = vmul.f32 0.6931472, %v104_v15 }
 0x10a   :  { %v62_v18 = vadd.f32 %v61_v16, %v53_v8 }
 0x10c   :  { %v70_v20 = vmul.f32 %v65_v14, %v62_v18 }
 0x10e   :  { %v71_v22 = vsub.f32 %v70_v20, %v69_v19 }
 0x110   :  { %v75_v23 = vperm.slane %v71_v22, %v74_v21 }
 0x112   :  { %78 = vst.msk [vmem:[#allocation7] sm:$0x1] %vm77_vm1, %v75_v23 }
 0x113   :  { %89 = dma.vmem_to_hbm [thread:$0]  %s85_s2, 16, %s87_s25, [#allocation4]  }
 0x114   :  { %181 = dma.done.wait [#allocation4], 16  }
 0x115   :  { %182 = vsyncadd [#allocation4], 4294967280 }
 0x116   :  { %94 = vsyncpa [#allocation3], 1 }
 0x117   :  { %95 = vsyncpa [#allocation6], 1 }
 0x118   :  { %96 = vsyncpa [#allocation4], 1 }

</bundles_post_ra>
